<compile_context>
chip_gen: v7x
topology: tpu7x:2x2x1
jax: 0.10.0
libtpu: 0.0.40
codegen_flags: <defaults>
</compile_context>

<pallas_src>
import jax
import jax.numpy as jnp
from jax.experimental import pallas as pl
from jax.experimental.pallas import tpu as pltpu

_LANE = 128


def _round_up(n: int, m: int) -> int:
    return ((n + m - 1) // m) * m


def prepare_text_projection_weight(w_t: jax.Array) -> jax.Array:
    """Pad (d_in, d_out) -> (d_in_p, d_out_p) and cast to bf16.

    Call ONCE per parameter (outside the hot path); text_projection() detects
    and accepts the prepared form, skipping the per-call pad/cast pass.
    """
    d_in, d_out = w_t.shape
    d_in_p, d_out_p = _round_up(d_in, _LANE), _round_up(d_out, _LANE)
    w_bf = w_t.astype(jnp.bfloat16)
    if (d_in_p, d_out_p) != (d_in, d_out):
        w_bf = jnp.zeros((d_in_p, d_out_p), jnp.bfloat16).at[:d_in, :d_out].set(w_bf)
    return w_bf


def _text_projection_kernel(x_ref, w_ref, o_ref):
    # x_ref: (block_b, d_in_p) bf16; w_ref: (d_in_p, d_out_p) bf16 (VMEM-resident);
    # o_ref: (block_b, d_out_p) out_dtype.
    y = jnp.dot(x_ref[...], w_ref[...], preferred_element_type=jnp.float32)
    # Row-wise L2 normalization in f32 (matches torch .norm(dim=1, keepdim=True)).
    # All-zero rows give NaN, exactly like x / ||x|| in the PyTorch reference.
    inv = jax.lax.rsqrt(jnp.sum(y * y, axis=1, keepdims=True))
    o_ref[...] = (y * inv).astype(o_ref.dtype)


def _vmem_capacity_bytes() -> int:
    try:
        return int(pltpu.get_tpu_info().vmem_capacity_bytes)
    except Exception:
        return 64 << 20  # conservative default (v7x per-core VMEM)


def _choose_block_b(B, d_in_p, d_out_p, out_itemsize, vmem_budget):
    weight_bytes = d_in_p * d_out_p * 2  # single-buffered resident bf16 weight
    # Per-row cost: double-buffered bf16 x tile + double-buffered out tile.
    per_row = 2 * d_in_p * 2 + 2 * d_out_p * out_itemsize
    avail = vmem_budget - weight_bytes - (2 << 20)  # sems / internal scratch
    # MXU-friendly 128 granularity for large batches; 16 (bf16 sublane pack)
    # floor keeps tiny batches from over-padding.
    gran = _LANE if B >= _LANE else 16
    max_rows = max(gran, avail // per_row) if per_row > 0 else gran
    # TODO(synk): if the resident weight alone exceeds the VMEM budget
    # (d_in_p*d_out_p >= ~26M on v7x), d_out would need tiling + two-pass norm.
    bb = max(gran, min(2048, (max_rows // gran) * gran))
    # Guarantee >= 2 grid steps so both v7x TensorCores get work, batch permitting.
    if B > 2 * gran:
        bb = min(bb, _round_up(pl.cdiv(B, 2), gran))
    # Keep batch-padding waste <= ~12.5%.
    while bb > gran and (_round_up(B, bb) - B) * 8 > _round_up(B, bb):
        bb = max(gran, (bb // 2 // gran) * gran)
    return max(gran, min(bb, _round_up(B, gran)))


def text_projection(x: jax.Array, w_t: jax.Array, *, d_out: int | None = None,
                    out_dtype=None, block_b: int | None = None) -> jax.Array:
    """y = l2_normalize(x @ w_t, axis=1).

    x   : (B, d_in) float array (cast to bf16 for the MXU).
    w_t : transposed nn.Linear weight, (d_in, d_out). For repeated calls pass
          the output of prepare_text_projection_weight() (padded bf16); it is
          detected automatically and no per-call pad/cast pass is emitted.
    d_out: logical output width; only needed with a pre-padded weight whose
          last dim exceeds the logical d_out.
    out_dtype: output dtype (default: x.dtype). bf16 halves output HBM traffic.
    """
    B, d_in = x.shape
    out_dtype = jnp.dtype(out_dtype) if out_dtype is not None else x.dtype
    out_itemsize = jnp.dtype(out_dtype).itemsize

    # Accept either a raw (d_in, d_out) weight or a pre-prepared padded bf16 one.
    w_is_prepared = (w_t.dtype == jnp.bfloat16
                     and w_t.shape[0] == _round_up(d_in, _LANE)
                     and w_t.shape[1] % _LANE == 0)
    if w_is_prepared:
        w_p = w_t
        d_in_p, d_out_p = w_p.shape
        d_out = d_out_p if d_out is None else d_out
    else:
        assert w_t.shape[0] == d_in, "w_t must be (d_in, d_out) = Linear.weight.T"
        d_out = w_t.shape[1] if d_out is None else d_out
        w_p = prepare_text_projection_weight(w_t)  # hoist out of hot loops!
        d_in_p, d_out_p = w_p.shape

    # Per-generation VMEM budget with headroom below the physical limit
    # (~52 MiB on v7x, ~100 MiB on v5e/v6e).
    vmem_budget = min(_vmem_capacity_bytes() - (12 << 20), 100 << 20)

    if block_b is None:
        block_b = _choose_block_b(B, d_in_p, d_out_p, out_itemsize, vmem_budget)
    block_b = max(16, _round_up(block_b, 16))
    B_p = _round_up(B, block_b)

    # Skip the x pad copy when already aligned (only a bf16 cast remains, and
    # not even that if x is already bf16).
    x_bf = x if x.dtype == jnp.bfloat16 else x.astype(jnp.bfloat16)
    if (B_p, d_in_p) != (B, d_in):
        x_p = jnp.zeros((B_p, d_in_p), jnp.bfloat16).at[:B, :d_in].set(x_bf)
    else:
        x_p = x_bf

    cost = pl.CostEstimate(
        flops=2 * B_p * d_in_p * d_out_p,
        transcendentals=B_p,
        bytes_accessed=(2 * B_p * d_in_p + 2 * d_in_p * d_out_p
                        + out_itemsize * B_p * d_out_p),
    )

    weight_bytes = d_in_p * d_out_p * 2
    vmem_use = (weight_bytes
                + 2 * block_b * d_in_p * 2
                + 2 * block_b * d_out_p * out_itemsize
                + (4 << 20))
    vmem_limit = int(min(max(vmem_use, 32 << 20), max(vmem_budget, 32 << 20)))

    def _call(single_buffer_weight: bool):
        w_kwargs = {"pipeline_mode": pl.Buffered(1)} if single_buffer_weight else {}
        grid_spec = pltpu.PrefetchScalarGridSpec(
            num_scalar_prefetch=0,
            grid=(B_p // block_b,),
            in_specs=[
                pl.BlockSpec((block_b, d_in_p), lambda i: (i, 0)),
                # Constant index_map -> weight stays VMEM-resident across steps.
                pl.BlockSpec((d_in_p, d_out_p), lambda i: (0, 0), **w_kwargs),
            ],
            out_specs=pl.BlockSpec((block_b, d_out_p), lambda i: (i, 0)),
        )
        return pl.pallas_call(
            _text_projection_kernel,
            out_shape=jax.ShapeDtypeStruct((B_p, d_out_p), out_dtype),
            grid_spec=grid_spec,
            compiler_params=pltpu.CompilerParams(
                dimension_semantics=("parallel",),
                vmem_limit_bytes=vmem_limit,
            ),
            cost_estimate=cost,
        )(x_p, w_p)

    try:
        out_p = _call(True)   # weight pinned to a single VMEM buffer
    except Exception:         # fallback if Buffered(1) is unsupported
        out_p = _call(False)

    if (B_p, d_out_p) == (B, d_out):
        return out_p          # no padding -> no extra unpad slice/copy
    return out_p[:B, :d_out]


if __name__ == "__main__":
    key = jax.random.PRNGKey(0)
    kx, kw = jax.random.split(key)

    B, d_in, d_out = 8, 32, 64

    x = jax.random.normal(kx, (B, d_in), dtype=jnp.float32)
    # nn.Linear(d_in, d_out, bias=False): weight is (d_out, d_in); the kernel
    # consumes its transpose (y = x @ W^T).
    bound = 1.0 / (d_in ** 0.5)
    w = jax.random.uniform(kw, (d_out, d_in), dtype=jnp.float32,
                           minval=-bound, maxval=bound)
    w_t = w.T

    out = jax.block_until_ready(text_projection(x, w_t))

    # Pre-prepared (padded bf16) weight path: same results, no per-call pad/cast.
    w_prepared = prepare_text_projection_weight(w_t)
    out2 = jax.block_until_ready(text_projection(x, w_prepared, d_out=d_out))

    # Reference in plain f32 JAX (kernel uses bf16 matmul inputs -> loose tol).
    ref = x @ w_t
    ref = ref / jnp.linalg.norm(ref, axis=1, keepdims=True)
    assert out.shape == ref.shape, "shape mismatch vs reference"
    assert jnp.allclose(out, ref, atol=3e-2, rtol=3e-2), "mismatch vs reference"
    assert jnp.allclose(out2, out, atol=1e-6, rtol=1e-6), "prepared-weight path mismatch"

    print("KERNEL_OK")
</pallas_src>

<mosaic_0001>
module attributes {stable_mosaic.version = 11 : i64} {
  func.func @_text_projection_kernel(%arg0: i32, %arg1: memref<16x128xbf16, #tpu.memory_space<vmem>>, %arg2: memref<128x128xbf16, #tpu.memory_space<vmem>>, %arg3: memref<16x128xf32, #tpu.memory_space<vmem>>) attributes {dimension_semantics = [#tpu.dimension_semantics<parallel>], iteration_bounds = array<i64: 1>, scalar_prefetch = 0 : i64, scratch_operands = 0 : i64, tpu.core_type = #tpu.core_type<tc>, window_params = [{transform_indices = @transform_0, window_bounds = array<i64: 16, 128>}, {pipeline_mode = #tpu.pipeline_mode<synchronous>, transform_indices = @transform_1, window_bounds = array<i64: 128, 128>}, {transform_indices = @transform_2, window_bounds = array<i64: 16, 128>}]} {
    %c0 = arith.constant 0 : index
    %c0_0 = arith.constant 0 : index
    %0 = vector.load %arg1[%c0, %c0_0] : memref<16x128xbf16, #tpu.memory_space<vmem>>, vector<16x128xbf16>
    %c0_1 = arith.constant 0 : index
    %c0_2 = arith.constant 0 : index
    %1 = vector.load %arg2[%c0_1, %c0_2] : memref<128x128xbf16, #tpu.memory_space<vmem>>, vector<128x128xbf16>
    %cst = arith.constant dense<0.000000e+00> : vector<16x128xf32>
    %2 = tpu.matmul %0, %1, %cst {dimension_numbers = #tpu.dot_dimension_numbers<[1], [0], [0], [1], [0, 0, 1, 1], [], []>} : vector<16x128xbf16>, vector<128x128xbf16>, vector<16x128xf32> -> vector<16x128xf32>
    %3 = arith.mulf %2, %2 : vector<16x128xf32>
    %cst_3 = arith.constant dense<0.000000e+00> : vector<16xf32>
    %4 = vector.multi_reduction <add>, %3, %cst_3 [1] : vector<16x128xf32> to vector<16xf32>
    %5 = vector.shape_cast %4 : vector<16xf32> to vector<16x1xf32>
    %6 = math.rsqrt %5 : vector<16x1xf32>
    %7 = vector.broadcast %6 : vector<16x1xf32> to vector<16x128xf32>
    %8 = arith.mulf %2, %7 : vector<16x128xf32>
    %c0_4 = arith.constant 0 : index
    %c0_5 = arith.constant 0 : index
    %9 = vector.load %arg3[%c0_4, %c0_5] : memref<16x128xf32, #tpu.memory_space<vmem>>, vector<16x128xf32>
    tpu.vector_store %arg3[%c0_4, %c0_5], %8 {strides = array<i32>} : memref<16x128xf32, #tpu.memory_space<vmem>>, vector<16x128xf32>,
    return
  }
  func.func @transform_0(%arg0: i32) -> (i32, i32) {
    %c0_i32 = arith.constant 0 : i32
    %c0_i32_0 = arith.constant 0 : i32
    return %arg0, %c0_i32 : i32, i32
  }
  func.func @transform_1(%arg0: i32) -> (i32, i32) {
    %c0_i32 = arith.constant 0 : i32
    %c0_i32_0 = arith.constant 0 : i32
    %c0_i32_1 = arith.constant 0 : i32
    return %c0_i32, %c0_i32_0 : i32, i32
  }
  func.func @transform_2(%arg0: i32) -> (i32, i32) {
    %c0_i32 = arith.constant 0 : i32
    %c0_i32_0 = arith.constant 0 : i32
    return %arg0, %c0_i32 : i32, i32
  }
}

module attributes {stable_mosaic.version = 11 : i64} {
  func.func @_text_projection_kernel(%arg0: i32, %arg1: memref<16x128xbf16, #tpu.memory_space<vmem>>, %arg2: memref<128x128xbf16, #tpu.memory_space<vmem>>, %arg3: memref<16x128xf32, #tpu.memory_space<vmem>>) attributes {dimension_semantics = [#tpu.dimension_semantics<parallel>], iteration_bounds = array<i64: 1>, scalar_prefetch = 0 : i64, scratch_operands = 0 : i64, tpu.core_type = #tpu.core_type<tc>, window_params = [{transform_indices = @transform_0, window_bounds = array<i64: 16, 128>}, {pipeline_mode = #tpu.pipeline_mode<synchronous>, transform_indices = @transform_1, window_bounds = array<i64: 128, 128>}, {transform_indices = @transform_2, window_bounds = array<i64: 16, 128>}]} {
    %c0 = arith.constant 0 : index
    %c0_0 = arith.constant 0 : index
    %0 = vector.load %arg1[%c0, %c0_0] : memref<16x128xbf16, #tpu.memory_space<vmem>>, vector<16x128xbf16>
    %c0_1 = arith.constant 0 : index
    %c0_2 = arith.constant 0 : index
    %1 = vector.load %arg2[%c0_1, %c0_2] : memref<128x128xbf16, #tpu.memory_space<vmem>>, vector<128x128xbf16>
    %cst = arith.constant dense<0.000000e+00> : vector<16x128xf32>
    %2 = tpu.matmul %0, %1, %cst {dimension_numbers = #tpu.dot_dimension_numbers<[1], [0], [0], [1], [0, 0, 1, 1], [], []>} : vector<16x128xbf16>, vector<128x128xbf16>, vector<16x128xf32> -> vector<16x128xf32>
    %3 = arith.mulf %2, %2 : vector<16x128xf32>
    %cst_3 = arith.constant dense<0.000000e+00> : vector<16xf32>
    %4 = vector.multi_reduction <add>, %3, %cst_3 [1] : vector<16x128xf32> to vector<16xf32>
    %5 = vector.shape_cast %4 : vector<16xf32> to vector<16x1xf32>
    %6 = math.rsqrt %5 : vector<16x1xf32>
    %7 = vector.broadcast %6 : vector<16x1xf32> to vector<16x128xf32>
    %8 = arith.mulf %2, %7 : vector<16x128xf32>
    %c0_4 = arith.constant 0 : index
    %c0_5 = arith.constant 0 : index
    %9 = vector.load %arg3[%c0_4, %c0_5] : memref<16x128xf32, #tpu.memory_space<vmem>>, vector<16x128xf32>
    tpu.vector_store %arg3[%c0_4, %c0_5], %8 {strides = array<i32>} : memref<16x128xf32, #tpu.memory_space<vmem>>, vector<16x128xf32>,
    return
  }
  func.func @transform_0(%arg0: i32) -> (i32, i32) {
    %c0_i32 = arith.constant 0 : i32
    %c0_i32_0 = arith.constant 0 : i32
    return %arg0, %c0_i32 : i32, i32
  }
  func.func @transform_1(%arg0: i32) -> (i32, i32) {
    %c0_i32 = arith.constant 0 : i32
    %c0_i32_0 = arith.constant 0 : i32
    %c0_i32_1 = arith.constant 0 : i32
    return %c0_i32, %c0_i32_0 : i32, i32
  }
  func.func @transform_2(%arg0: i32) -> (i32, i32) {
    %c0_i32 = arith.constant 0 : i32
    %c0_i32_0 = arith.constant 0 : i32
    return %arg0, %c0_i32 : i32, i32
  }
}

</mosaic_0001>

<bundles_post_ra>
// kernel: tpu_custom_call.1
= control target key start
LH: loop header
LB: loop body
LE: loop exit
PB: predicated region body
PF: predicated region fallthrough
CT: control target
= control target key end

     0   :  { %7 = vsyncpa [#allocation3], 0  ;;  %s376_s0 = inlined_call_operand.hbm [shape: bf16[16,128], index: 0, kind: input, shape index: {}]   ;;  %s377_s1 = inlined_call_operand.hbm [shape: bf16[128,128], index: 1, kind: input, shape index: {}]   ;;  %s378_s2 = inlined_call_operand.hbm [shape: f32[16,128], index: 2, kind: output, shape index: {}]  }
   0x1   :  { %8 = vsyncpa [#allocation6], 0 }
   0x2   :  { %9 = vsyncpa [#allocation4], 0  ;;  %s316_s9 = smov [#allocation2]   ;;  %s244_s13 = scalar_lea.hbm %s376_s0, 128 }
   0x3   :  { %s15_s10 = sshll.u32 %s316_s9, 4  ;;  %p245_p0 = scmp.ne.s32.totalorder %s376_s0, %s244_s13  ;;  %s16_s10 = int_to_ptr.vmem [resolvable:$true] %s15_s10 }
   0x4   :  { %p248_p1 = scmp.lt.u32.totalorder %s244_s13, %s376_s0 }
   0x6   :  { %p250_p2 = pnand %p248_p1, %p245_p0 }
   0x8   :  { %253 = shalt.err (!%p250_p2)
}
   0x9   :  { %s254_s18 = scalar_lea.vmem %s16_s10, 128  ;;  %p259_p4 = scmp.lt.s32.totalorder %s16_s10, %s16_s10 }
   0xa   :  { %p255_p3 = scmp.ne.s32.totalorder %s16_s10, %s254_s18  ;;  %p260_p5 = scmp.lt.s32.totalorder %s254_s18, %s254_s18 }
   0xc   :  { %p261_p6 = por %p260_p5, %p259_p4 }
   0xe   :  { %p262_p7 = pnand %p261_p6, %p255_p3 }
  0x10   :  { %265 = shalt.err (!%p262_p7)
}
  0x11   :  { %s317_s19 = smov 64   ;;  %s318_s20 = smov 4  }
  0x12   :  { %21 = dma.hbm_to_vmem [thread:$0]  %s376_s0, 128, %s16_s10, [#allocation3], %s317_s19, %s317_s19, %s318_s20  }
  0x13   :  { %s319_s23 = smov [#allocation5]   ;;  %s266_s27 = scalar_lea.hbm %s377_s1, 1024 }
  0x14   :  { %s27_s24 = sshll.u32 %s319_s23, 4  ;;  %p267_p8 = scmp.ne.s32.totalorder %s377_s1, %s266_s27  ;;  %s28_s24 = int_to_ptr.vmem [resolvable:$true] %s27_s24 }
  0x15   :  { %p270_p9 = scmp.lt.u32.totalorder %s266_s27, %s377_s1 }
  0x17   :  { %p272_p10 = pnand %p270_p9, %p267_p8 }
  0x19   :  { %275 = shalt.err (!%p272_p10)
}
  0x1a   :  { %s276_s4 = scalar_lea.vmem %s28_s24, 1024  ;;  %p281_p12 = scmp.lt.s32.totalorder %s28_s24, %s28_s24 }
  0x1b   :  { %p277_p11 = scmp.ne.s32.totalorder %s28_s24, %s276_s4  ;;  %p282_p13 = scmp.lt.s32.totalorder %s276_s4, %s276_s4 }
  0x1d   :  { %p283_p0 = por %p282_p13, %p281_p12 }
  0x1f   :  { %p284_p1 = pnand %p283_p0, %p277_p11 }
  0x21   :  { %287 = shalt.err (!%p284_p1)
}
  0x22   :  { %33 = dma.hbm_to_vmem [thread:$0]  %s377_s1, 1024, %s28_s24, [#allocation6], %s317_s19, %s317_s19, %s318_s20  }
  0x23   :  { %310 = dma.done.wait [#allocation3], 128  }
  0x24   :  { %311 = vsyncadd [#allocation3], 4294967168 }
  0x25   :  { %312 = dma.done.wait [#allocation6], 1024  }
  0x26   :  { %313 = vsyncadd [#allocation6], 4294966272  ;;  %v320_v0 = vmov 0.0   ;;  %vm321_vm0 = vmmov 0   ;;  %v231_v1 = vld [vmem:[#allocation5] sm:$0xff]   ;;  %v232_v2 = vld [vmem:[#allocation5 + $0x8] sm:$0xff]  }
  0x27   :  { %202 = vmatprep.subr.bf16.mxu0 %v320_v0  ;;  %218 = vmatprep.mubr.msk.bf16.mxu0 %vm321_vm0, %v320_v0  ;;  %v233_v3 = vld [vmem:[#allocation5 + $0x10] sm:$0xff]   ;;  %v234_v4 = vld [vmem:[#allocation5 + $0x18] sm:$0xff]   ;;  %v235_v5 = vld [vmem:[#allocation5 + $0x20] sm:$0xff]   ;;  %s322_s1 = smov [#allocation7]  }
  0x28   :  { %203 = vmatpush3.bf16.msra.mxu0 %v231_v1  ;;  %v236_v6 = vld [vmem:[#allocation5 + $0x28] sm:$0xff]   ;;  %v237_v7 = vld [vmem:[#allocation5 + $0x30] sm:$0xff]   ;;  %v238_v8 = vld [vmem:[#allocation5 + $0x38] sm:$0xff]   ;;  %s171_s6 = sshll.u32 %s322_s1, 4  ;;  %s172_s6 = int_to_ptr.vmem [resolvable:$true] %s171_s6 }
  0x29   :  { %204 = vmatprep.subr.bf16.mxu0 %v320_v0  ;;  %v239_v9 = vld [vmem:[#allocation2] sm:$0xff]   ;;  %s288_s7 = scalar_lea.vmem %s172_s6, 256  ;;  %p293_p3 = scmp.lt.s32.totalorder %s172_s6, %s172_s6 }
  0x2a   :  { %p289_p2 = scmp.ne.s32.totalorder %s172_s6, %s288_s7  ;;  %p294_p4 = scmp.lt.s32.totalorder %s288_s7, %s288_s7 }
  0x2c   :  { %205 = vmatpush3.bf16.msra.mxu0 %v232_v2  ;;  %p295_p5 = por %p294_p4, %p293_p3 }
  0x2d   :  { %206 = vmatprep.subr.bf16.mxu0 %v320_v0 }
  0x2e   :  { %p296_p6 = pnand %p295_p5, %p289_p2 }
  0x30   :  { %207 = vmatpush3.bf16.msra.mxu0 %v233_v3 }
  0x31   :  { %208 = vmatprep.subr.bf16.mxu0 %v320_v0 }
  0x34   :  { %209 = vmatpush3.bf16.msra.mxu0 %v234_v4 }
  0x35   :  { %210 = vmatprep.subr.bf16.mxu0 %v320_v0 }
  0x38   :  { %211 = vmatpush3.bf16.msra.mxu0 %v235_v5 }
  0x39   :  { %212 = vmatprep.subr.bf16.mxu0 %v320_v0 }
  0x3c   :  { %213 = vmatpush3.bf16.msra.mxu0 %v236_v6 }
  0x3d   :  { %214 = vmatprep.subr.bf16.mxu0 %v320_v0 }
  0x40   :  { %215 = vmatpush3.bf16.msra.mxu0 %v237_v7 }
  0x41   :  { %216 = vmatprep.subr.bf16.mxu0 %v320_v0 }
  0x44   :  { %217 = vmatpush3.bf16.msra.mxu0 %v238_v8 }
  0x47   :  { %219 = vmatmul.mubr.bf16.vlgmr.msra.gmra.mrb[0].mxu0 %v239_v9 }
 0x11a   :  { %v147_v10 = vpop.f32.mrb[0].mxu0 }
 0x11b   :  { %v220_v11 = vpop.f32.mrb[1].mxu0  ;;  %v154_v12 = vmul.f32 %v147_v10, %v147_v10 }
 0x11c   :  { %v150_v13 = vpop.f32.mrb[2].mxu0 }
 0x11d   :  { %156 = vadd.xlane.f32.xlu0 %v154_v12  ;;  %v221_v14 = vpop.f32.mrb[3].mxu0  ;;  %v155_v15 = vmul.f32 %v150_v13, %v150_v13 }
 0x121   :  { %158 = vadd.xlane.f32.xlu0 %v155_v15 }
 0x1aa   :  { %v157_v16 = vpop.xlane.xlu0 %156 }
 0x1ab   :  { %240 = vrsqrt.f32 %v157_v16 }
 0x1ae   :  { %v159_v17 = vpop.xlane.xlu0 %158 }
 0x1af   :  { %242 = vrsqrt.f32 %v159_v17 }
 0x1b5   :  { %v241_v18 = vpop.eup %240 }
 0x1b6   :  { %v162_v19 = vmul.f32 %v241_v18, %v147_v10 }
 0x1b8   :  { %164 = vst [vmem:[#allocation7] sm:$0xff] %v162_v19 }
 0x1b9   :  { %v243_v20 = vpop.eup %242 }
 0x1ba   :  { %v163_v21 = vmul.f32 %v243_v20, %v150_v13 }
 0x1bc   :  { %165 = vst [vmem:[#allocation7 + $0x8] sm:$0xff] %v163_v21 }
 0x1bd   :  { %299 = shalt.err (!%p296_p6)
}
 0x1be   :  { %s300_s10 = scalar_lea.hbm %s378_s2, 256 }
 0x1bf   :  { %p301_p7 = scmp.ne.s32.totalorder %s378_s2, %s300_s10  ;;  %p304_p8 = scmp.lt.u32.totalorder %s300_s10, %s378_s2 }
 0x1c1   :  { %p306_p9 = pnand %p304_p8, %p301_p7 }
 0x1c3   :  { %309 = shalt.err (!%p306_p9)
}
 0x1c4   :  { %s323_s15 = smov 128   ;;  %s324_s16 = smov 8  }
 0x1c5   :  { %177 = dma.vmem_to_hbm [thread:$0]  %s172_s6, 256, %s378_s2, [#allocation4], %s323_s15, %s323_s15, %s324_s16  }
 0x1c6   :  { %314 = dma.done.wait [#allocation4], 256  }
 0x1c7   :  { %315 = vsyncadd [#allocation4], 4294967040 }
 0x1c8   :  { %181 = vsyncpa [#allocation3], 1 }
 0x1c9   :  { %182 = vsyncpa [#allocation6], 1 }
 0x1ca   :  { %183 = vsyncpa [#allocation4], 1 }

// kernel: tpu_custom_call.1
= control target key start
LH: loop header
LB: loop body
LE: loop exit
PB: predicated region body
PF: predicated region fallthrough
CT: control target
= control target key end

     0   :  { %7 = vsyncpa [#allocation3], 0  ;;  %s376_s0 = inlined_call_operand.hbm [shape: bf16[16,128], index: 0, kind: input, shape index: {}]   ;;  %s377_s1 = inlined_call_operand.hbm [shape: bf16[128,128], index: 1, kind: input, shape index: {}]   ;;  %s378_s2 = inlined_call_operand.hbm [shape: f32[16,128], index: 2, kind: output, shape index: {}]  }
   0x1   :  { %8 = vsyncpa [#allocation6], 0 }
   0x2   :  { %9 = vsyncpa [#allocation4], 0  ;;  %s316_s9 = smov [#allocation2]   ;;  %s244_s13 = scalar_lea.hbm %s376_s0, 128 }
   0x3   :  { %s15_s10 = sshll.u32 %s316_s9, 4  ;;  %p245_p0 = scmp.ne.s32.totalorder %s376_s0, %s244_s13  ;;  %s16_s10 = int_to_ptr.vmem [resolvable:$true] %s15_s10 }
   0x4   :  { %p248_p1 = scmp.lt.u32.totalorder %s244_s13, %s376_s0 }
   0x6   :  { %p250_p2 = pnand %p248_p1, %p245_p0 }
   0x8   :  { %253 = shalt.err (!%p250_p2)
}
   0x9   :  { %s254_s18 = scalar_lea.vmem %s16_s10, 128  ;;  %p259_p4 = scmp.lt.s32.totalorder %s16_s10, %s16_s10 }
   0xa   :  { %p255_p3 = scmp.ne.s32.totalorder %s16_s10, %s254_s18  ;;  %p260_p5 = scmp.lt.s32.totalorder %s254_s18, %s254_s18 }
   0xc   :  { %p261_p6 = por %p260_p5, %p259_p4 }
   0xe   :  { %p262_p7 = pnand %p261_p6, %p255_p3 }
  0x10   :  { %265 = shalt.err (!%p262_p7)
}
  0x11   :  { %s317_s19 = smov 64   ;;  %s318_s20 = smov 4  }
  0x12   :  { %21 = dma.hbm_to_vmem [thread:$0]  %s376_s0, 128, %s16_s10, [#allocation3], %s317_s19, %s317_s19, %s318_s20  }
  0x13   :  { %s319_s23 = smov [#allocation5]   ;;  %s266_s27 = scalar_lea.hbm %s377_s1, 1024 }
  0x14   :  { %s27_s24 = sshll.u32 %s319_s23, 4  ;;  %p267_p8 = scmp.ne.s32.totalorder %s377_s1, %s266_s27  ;;  %s28_s24 = int_to_ptr.vmem [resolvable:$true] %s27_s24 }
  0x15   :  { %p270_p9 = scmp.lt.u32.totalorder %s266_s27, %s377_s1 }
  0x17   :  { %p272_p10 = pnand %p270_p9, %p267_p8 }
  0x19   :  { %275 = shalt.err (!%p272_p10)
}
  0x1a   :  { %s276_s4 = scalar_lea.vmem %s28_s24, 1024  ;;  %p281_p12 = scmp.lt.s32.totalorder %s28_s24, %s28_s24 }
  0x1b   :  { %p277_p11 = scmp.ne.s32.totalorder %s28_s24, %s276_s4  ;;  %p282_p13 = scmp.lt.s32.totalorder %s276_s4, %s276_s4 }
  0x1d   :  { %p283_p0 = por %p282_p13, %p281_p12 }
  0x1f   :  { %p284_p1 = pnand %p283_p0, %p277_p11 }
  0x21   :  { %287 = shalt.err (!%p284_p1)
}
  0x22   :  { %33 = dma.hbm_to_vmem [thread:$0]  %s377_s1, 1024, %s28_s24, [#allocation6], %s317_s19, %s317_s19, %s318_s20  }
  0x23   :  { %310 = dma.done.wait [#allocation3], 128  }
  0x24   :  { %311 = vsyncadd [#allocation3], 4294967168 }
  0x25   :  { %312 = dma.done.wait [#allocation6], 1024  }
  0x26   :  { %313 = vsyncadd [#allocation6], 4294966272  ;;  %v320_v0 = vmov 0.0   ;;  %vm321_vm0 = vmmov 0   ;;  %v231_v1 = vld [vmem:[#allocation5] sm:$0xff]   ;;  %v232_v2 = vld [vmem:[#allocation5 + $0x8] sm:$0xff]  }
  0x27   :  { %202 = vmatprep.subr.bf16.mxu0 %v320_v0  ;;  %218 = vmatprep.mubr.msk.bf16.mxu0 %vm321_vm0, %v320_v0  ;;  %v233_v3 = vld [vmem:[#allocation5 + $0x10] sm:$0xff]   ;;  %v234_v4 = vld [vmem:[#allocation5 + $0x18] sm:$0xff]   ;;  %v235_v5 = vld [vmem:[#allocation5 + $0x20] sm:$0xff]   ;;  %s322_s1 = smov [#allocation7]  }
  0x28   :  { %203 = vmatpush3.bf16.msra.mxu0 %v231_v1  ;;  %v236_v6 = vld [vmem:[#allocation5 + $0x28] sm:$0xff]   ;;  %v237_v7 = vld [vmem:[#allocation5 + $0x30] sm:$0xff]   ;;  %v238_v8 = vld [vmem:[#allocation5 + $0x38] sm:$0xff]   ;;  %s171_s6 = sshll.u32 %s322_s1, 4  ;;  %s172_s6 = int_to_ptr.vmem [resolvable:$true] %s171_s6 }
  0x29   :  { %204 = vmatprep.subr.bf16.mxu0 %v320_v0  ;;  %v239_v9 = vld [vmem:[#allocation2] sm:$0xff]   ;;  %s288_s7 = scalar_lea.vmem %s172_s6, 256  ;;  %p293_p3 = scmp.lt.s32.totalorder %s172_s6, %s172_s6 }
  0x2a   :  { %p289_p2 = scmp.ne.s32.totalorder %s172_s6, %s288_s7  ;;  %p294_p4 = scmp.lt.s32.totalorder %s288_s7, %s288_s7 }
  0x2c   :  { %205 = vmatpush3.bf16.msra.mxu0 %v232_v2  ;;  %p295_p5 = por %p294_p4, %p293_p3 }
  0x2d   :  { %206 = vmatprep.subr.bf16.mxu0 %v320_v0 }
  0x2e   :  { %p296_p6 = pnand %p295_p5, %p289_p2 }
  0x30   :  { %207 = vmatpush3.bf16.msra.mxu0 %v233_v3 }
  0x31   :  { %208 = vmatprep.subr.bf16.mxu0 %v320_v0 }
  0x34   :  { %209 = vmatpush3.bf16.msra.mxu0 %v234_v4 }
  0x35   :  { %210 = vmatprep.subr.bf16.mxu0 %v320_v0 }
  0x38   :  { %211 = vmatpush3.bf16.msra.mxu0 %v235_v5 }
  0x39   :  { %212 = vmatprep.subr.bf16.mxu0 %v320_v0 }
  0x3c   :  { %213 = vmatpush3.bf16.msra.mxu0 %v236_v6 }
  0x3d   :  { %214 = vmatprep.subr.bf16.mxu0 %v320_v0 }
  0x40   :  { %215 = vmatpush3.bf16.msra.mxu0 %v237_v7 }
  0x41   :  { %216 = vmatprep.subr.bf16.mxu0 %v320_v0 }
  0x44   :  { %217 = vmatpush3.bf16.msra.mxu0 %v238_v8 }
  0x47   :  { %219 = vmatmul.mubr.bf16.vlgmr.msra.gmra.mrb[0].mxu0 %v239_v9 }
 0x11a   :  { %v147_v10 = vpop.f32.mrb[0].mxu0 }
 0x11b   :  { %v220_v11 = vpop.f32.mrb[1].mxu0  ;;  %v154_v12 = vmul.f32 %v147_v10, %v147_v10 }
 0x11c   :  { %v150_v13 = vpop.f32.mrb[2].mxu0 }
 0x11d   :  { %156 = vadd.xlane.f32.xlu0 %v154_v12  ;;  %v221_v14 = vpop.f32.mrb[3].mxu0  ;;  %v155_v15 = vmul.f32 %v150_v13, %v150_v13 }
 0x121   :  { %158 = vadd.xlane.f32.xlu0 %v155_v15 }
 0x1aa   :  { %v157_v16 = vpop.xlane.xlu0 %156 }
 0x1ab   :  { %240 = vrsqrt.f32 %v157_v16 }
 0x1ae   :  { %v159_v17 = vpop.xlane.xlu0 %158 }
 0x1af   :  { %242 = vrsqrt.f32 %v159_v17 }
 0x1b5   :  { %v241_v18 = vpop.eup %240 }
 0x1b6   :  { %v162_v19 = vmul.f32 %v241_v18, %v147_v10 }
 0x1b8   :  { %164 = vst [vmem:[#allocation7] sm:$0xff] %v162_v19 }
 0x1b9   :  { %v243_v20 = vpop.eup %242 }
 0x1ba   :  { %v163_v21 = vmul.f32 %v243_v20, %v150_v13 }
 0x1bc   :  { %165 = vst [vmem:[#allocation7 + $0x8] sm:$0xff] %v163_v21 }
 0x1bd   :  { %299 = shalt.err (!%p296_p6)
}
 0x1be   :  { %s300_s10 = scalar_lea.hbm %s378_s2, 256 }
 0x1bf   :  { %p301_p7 = scmp.ne.s32.totalorder %s378_s2, %s300_s10  ;;  %p304_p8 = scmp.lt.u32.totalorder %s300_s10, %s378_s2 }
 0x1c1   :  { %p306_p9 = pnand %p304_p8, %p301_p7 }
 0x1c3   :  { %309 = shalt.err (!%p306_p9)
}
 0x1c4   :  { %s323_s15 = smov 128   ;;  %s324_s16 = smov 8  }
 0x1c5   :  { %177 = dma.vmem_to_hbm [thread:$0]  %s172_s6, 256, %s378_s2, [#allocation4], %s323_s15, %s323_s15, %s324_s16  }
 0x1c6   :  { %314 = dma.done.wait [#allocation4], 256  }
 0x1c7   :  { %315 = vsyncadd [#allocation4], 4294967040 }
 0x1c8   :  { %181 = vsyncpa [#allocation3], 1 }
 0x1c9   :  { %182 = vsyncpa [#allocation6], 1 }
 0x1ca   :  { %183 = vsyncpa [#allocation4], 1 }

</bundles_post_ra>
